<compile_context>
chip_gen: v7x
topology: tpu7x:2x2x1
jax: 0.10.0
libtpu: 0.0.40
codegen_flags: <defaults>
</compile_context>

<pallas_src>
import functools

import jax
import jax.numpy as jnp
from jax.experimental import pallas as pl
from jax.experimental.pallas import tpu as pltpu


def _round_up(n, m):
    return ((n + m - 1) // m) * m


def _vmem_capacity_bytes(default=64 * 1024 * 1024):
    """Physical VMEM of the current chip (fallback: v7x's 64 MiB, the smallest)."""
    try:
        info = pltpu.get_tpu_info()
    except Exception:
        return default
    for name in ("vmem_capacity_bytes", "vmem_size_bytes", "vmem_bytes"):
        cap = getattr(info, name, None)
        if cap:
            return int(cap)
    return default


def _pick_block_b(batch, max_block=64):
    """Largest multiple-of-8 divisor of `batch` (capped), preferring >=2 batch
    tiles so the 'parallel' batch axis can split across v7x's two TensorCores.
    Falls back to the full batch when batch % 8 != 0 (block must be a multiple
    of 8 or the full dim)."""
    if batch % 8 != 0:
        return batch
    cands = [b for b in range(8, min(batch, max_block) + 1, 8) if batch % b == 0]
    if not cands:
        return batch
    two_tile = [b for b in cands if batch // b >= 2]
    return max(two_tile) if two_tile else max(cands)


def se_kernel(x_ref, w1_ref, b1_ref, w2_ref, b2_ref, o_ref, acc_ref, *,
              hw, block_hw, num_k, inv_hw, with_sigmoid):
    # x_ref : (block_b, C, block_hw)  input tile, native dtype
    # w1_ref: (C, hid)   b1_ref: (1, hid)
    # w2_ref: (hid, C)   b2_ref: (1, C)
    # o_ref : (block_b, C)
    # acc_ref: (block_b, C) f32 scratch (pooled sums; persists across k steps)
    k = pl.program_id(1)

    @pl.when(k == 0)
    def _init():
        acc_ref[...] = jnp.zeros_like(acc_ref)

    # Load in the input's native dtype (bf16 streams at half the HBM bytes),
    # cast to f32 for the accumulate.  Lane axis = spatial tile (>=128 wide).
    x32 = x_ref[...].astype(jnp.float32)

    valid_last = hw - (num_k - 1) * block_hw  # static: valid lanes of last tile
    if valid_last == block_hw:
        # H*W is an exact multiple of the spatial tile: no masking anywhere.
        acc_ref[...] += jnp.sum(x32, axis=-1)
    else:
        # Grid over-covers H*W; the OOB lane region of the edge block is
        # undefined, so masking the last tile is mandatory (and only costs VPU
        # ops, which have plenty of slack in this DMA-bound kernel).
        @pl.when(k < num_k - 1)
        def _full_tile():
            acc_ref[...] += jnp.sum(x32, axis=-1)

        @pl.when(k == num_k - 1)
        def _ragged_tile():
            lane = jax.lax.broadcasted_iota(jnp.int32, x32.shape, x32.ndim - 1)
            acc_ref[...] += jnp.sum(jnp.where(lane < valid_last, x32, 0.0), axis=-1)

    @pl.when(k == num_k - 1)
    def _epilogue():
        # Global average pool: one scale by 1/(H*W) on the accumulated sums
        # (so zero contributions from the masked lanes are mean-neutral).
        y = acc_ref[...] * inv_hw                                   # (block_b, C) f32
        # fc[0]: Linear(C, C//r) + ReLU -- feed the MXU the weights' native dtype.
        h = jnp.dot(y.astype(w1_ref.dtype), w1_ref[...],
                    preferred_element_type=jnp.float32)
        h = jnp.maximum(h + b1_ref[...].astype(jnp.float32), 0.0)   # (block_b, hid)
        # fc[2]: Linear(C//r, C)
        out = jnp.dot(h.astype(w2_ref.dtype), w2_ref[...],
                      preferred_element_type=jnp.float32)
        out = out + b2_ref[...].astype(jnp.float32)                 # (block_b, C)
        if with_sigmoid:
            out = jax.nn.sigmoid(out)
        o_ref[...] = out.astype(o_ref.dtype)


def se_layer(x, w1, b1, w2, b2, *, with_sigmoid=False, block_hw=None,
             max_block_b=64, single_buffer_params=True, vmem_limit_bytes=None):
    """x: (B, C, H, W). PyTorch nn.Linear weight layout:
    w1: (C//r, C), b1: (C//r,), w2: (C, C//r), b2: (C,).
    Returns the excitation weights with shape (B, C, 1, 1)."""
    B, C, H, W = x.shape
    hid = w1.shape[0]
    hw = H * W
    itemsize = jnp.dtype(x.dtype).itemsize
    p_itemsize = jnp.dtype(w1.dtype).itemsize

    # ---- generation-aware VMEM budget -------------------------------------
    # v5e/v6e: 128 MiB physical -> ~96 MiB scoped; v7x: 64 MiB -> ~48 MiB.
    vmem_cap = _vmem_capacity_bytes()
    if vmem_limit_bytes is None:
        vmem_limit_bytes = min(vmem_cap * 3 // 4, 96 * 1024 * 1024)
    vmem_limit_bytes = int(vmem_limit_bytes)

    # ---- batch (sublane) tile ----------------------------------------------
    block_b = _pick_block_b(B, max_block_b)
    num_i = B // block_b if B % block_b == 0 else pl.cdiv(B, block_b)

    # ---- resident bytes: FC params (+acc +out), then spend the rest on x ---
    param_bytes = (w1.size + b1.size + w2.size + b2.size) * p_itemsize
    if not single_buffer_params:
        param_bytes *= 2
    resident = param_bytes + block_b * C * 4 + 2 * block_b * C * itemsize
    x_budget = max(vmem_limit_bytes - resident - (2 << 20),
                   2 * block_b * C * 128 * itemsize)

    # ---- spatial (lane) tile: multiple of 128, as large as the budget allows
    # (target ~2048 lanes; 128-wide tiles reach only ~29% of the HBM roofline
    # vs 85%+ at 512-2048, so 128 is a correctness-test config only).
    hw_pad = _round_up(hw, 128)
    row_bytes = block_b * C * itemsize
    max_hw_budget = max(128, (x_budget // (2 * row_bytes)) // 128 * 128)
    if block_hw is None:
        if hw <= 128:
            block_hw = hw                     # single full-extent block
        else:
            block_hw = min(2048, max_hw_budget, hw_pad)
            block_hw = max(128, block_hw // 128 * 128)
    else:
        block_hw = max(128, min(block_hw, hw_pad) // 128 * 128)
        block_hw = min(block_hw, max_hw_budget)
    num_k = pl.cdiv(hw, block_hw)

    # (B, C, H, W) -> (B, C, H*W): free for contiguous NCHW.  No padding pass:
    # the ragged last spatial tile is masked inside the kernel.
    x3 = x.reshape(B, C, hw)

    kernel = functools.partial(se_kernel, hw=hw, block_hw=block_hw, num_k=num_k,
                               inv_hw=1.0 / hw, with_sigmoid=with_sigmoid)

    def _param_spec(shape, single):
        if single:
            # Constant index map -> fetched once; single-buffer it so it does
            # not take 2x VMEM away from the streamed x tile.
            return pl.BlockSpec(shape, lambda i, k: (0, 0),
                                pipeline_mode=pl.Buffered(1))
        return pl.BlockSpec(shape, lambda i, k: (0, 0))

    def _run(single):
        return pl.pallas_call(
            kernel,
            out_shape=jax.ShapeDtypeStruct((B, C), x.dtype),
            grid_spec=pltpu.PrefetchScalarGridSpec(
                num_scalar_prefetch=0,
                grid=(num_i, num_k),
                in_specs=[
                    # x streams through VMEM (double-buffered by BlockSpec).
                    pl.BlockSpec((block_b, C, block_hw), lambda i, k: (i, 0, k)),
                    _param_spec((C, hid), single),
                    _param_spec((1, hid), single),
                    _param_spec((hid, C), single),
                    _param_spec((1, C), single),
                ],
                out_specs=pl.BlockSpec((block_b, C), lambda i, k: (i, 0)),
                scratch_shapes=[pltpu.VMEM((block_b, C), jnp.float32)],
            ),
            compiler_params=pltpu.CompilerParams(
                # Batch-tile axis splits across TensorCores (v7x megacore);
                # the spatial reduction axis must stay sequential.
                # TODO(synk): if plain "parallel" does not shard on v7x, switch
                # the batch axis to pltpu.CORE_PARALLEL / an explicit core_map.
                dimension_semantics=("parallel", "arbitrary"),
                vmem_limit_bytes=vmem_limit_bytes,
            ),
        )(x3, w1.T, b1.reshape(1, hid), w2.T, b2.reshape(1, C))

    if single_buffer_params:
        try:
            out = _run(True)
        except Exception:
            # Installed JAX may not support pipeline_mode / Buffered(1); the
            # params are tiny, so plain double-buffering is a fine fallback.
            out = _run(False)
    else:
        out = _run(False)

    return out.reshape(B, C, 1, 1)


def se_layer_ref(x, w1, b1, w2, b2, *, with_sigmoid=False):
    """Plain-JAX reference for correctness checking."""
    b, c, _, _ = x.shape
    y = jnp.mean(x.astype(jnp.float32), axis=(2, 3))
    h = jnp.maximum(y @ w1.T + b1, 0.0)
    out = h @ w2.T + b2
    if with_sigmoid:
        out = jax.nn.sigmoid(out)
    return out.astype(x.dtype).reshape(b, c, 1, 1)


if __name__ == "__main__":
    # Small shapes consistent with the module: channel divisible by reduction.
    channel, reduction = 32, 16
    hidden = channel // reduction

    key = jax.random.PRNGKey(0)
    kx0, kx1, kx2, k1, k2, k3, k4 = jax.random.split(key, 7)

    # Deterministic synthetic parameter init (PyTorch Linear shapes).
    bound1 = 1.0 / (channel ** 0.5)
    bound2 = 1.0 / (hidden ** 0.5)
    w1 = jax.random.uniform(k1, (hidden, channel), jnp.float32, -bound1, bound1)
    b1 = jax.random.uniform(k2, (hidden,), jnp.float32, -bound1, bound1)
    w2 = jax.random.uniform(k3, (channel, hidden), jnp.float32, -bound2, bound2)
    b2 = jax.random.uniform(k4, (channel,), jnp.float32, -bound2, bound2)

    cases = [
        # (x shape, x key, kwargs)
        ((2, channel, 16, 16), kx0, {}),                  # even H*W, auto tiles
        # block_hw=128 is a correctness-test config only (exercises the
        # multi-step accumulate + ragged in-kernel masking path).
        ((2, channel, 17, 15), kx1, {"block_hw": 128}),
        ((16, channel, 16, 16), kx2, {}),                 # multiple batch tiles
    ]

    for shape, xkey, kw in cases:
        x = jax.random.normal(xkey, shape, dtype=jnp.float32)
        for with_sigmoid in (False, True):
            out = se_layer(x, w1, b1, w2, b2, with_sigmoid=with_sigmoid, **kw)
            out = jax.block_until_ready(out)
            ref = se_layer_ref(x, w1, b1, w2, b2, with_sigmoid=with_sigmoid)
            assert out.shape == (shape[0], channel, 1, 1)
            assert jnp.allclose(out, ref, atol=1e-5, rtol=1e-5), (
                f"mismatch vs reference (shape={shape}, with_sigmoid={with_sigmoid})")

    print("KERNEL_OK")
</pallas_src>

<mosaic_0001>
module attributes {stable_mosaic.version = 11 : i64} {
  func.func @se_kernel(%arg0: i32, %arg1: i32, %arg2: memref<2x32x256xf32, #tpu.memory_space<vmem>>, %arg3: memref<32x2xf32, #tpu.memory_space<vmem>>, %arg4: memref<1x2xf32, #tpu.memory_space<vmem>>, %arg5: memref<2x32xf32, #tpu.memory_space<vmem>>, %arg6: memref<1x32xf32, #tpu.memory_space<vmem>>, %arg7: memref<2x32xf32, #tpu.memory_space<vmem>>, %arg8: memref<2x32xf32, #tpu.memory_space<vmem>>) attributes {dimension_semantics = [#tpu.dimension_semantics<parallel>, #tpu.dimension_semantics<arbitrary>], iteration_bounds = array<i64: 1, 1>, scalar_prefetch = 0 : i64, scratch_operands = 1 : i64, tpu.core_type = #tpu.core_type<tc>, window_params = [{transform_indices = @transform_0, window_bounds = array<i64: 2, 32, 256>}, {pipeline_mode = #tpu.pipeline_mode<synchronous>, transform_indices = @transform_1, window_bounds = array<i64: 32, 2>}, {pipeline_mode = #tpu.pipeline_mode<synchronous>, transform_indices = @transform_2, window_bounds = array<i64: 1, 2>}, {pipeline_mode = #tpu.pipeline_mode<synchronous>, transform_indices = @transform_3, window_bounds = array<i64: 2, 32>}, {pipeline_mode = #tpu.pipeline_mode<synchronous>, transform_indices = @transform_4, window_bounds = array<i64: 1, 32>}, {transform_indices = @transform_5, window_bounds = array<i64: 2, 32>}]} {
    %c0_i32 = arith.constant 0 : i32
    %0 = arith.cmpi eq, %arg1, %c0_i32 : i32
    %1 = arith.extui %0 : i1 to i32
    %c0_i32_0 = arith.constant 0 : i32
    %2 = arith.cmpi ne, %1, %c0_i32_0 : i32
    scf.if %2 {
      %cst_9 = arith.constant 0.000000e+00 : f32
      %11 = vector.broadcast %cst_9 : f32 to vector<2x32xf32>
      %c0_10 = arith.constant 0 : index
      %c0_11 = arith.constant 0 : index
      %12 = vector.load %arg8[%c0_10, %c0_11] : memref<2x32xf32, #tpu.memory_space<vmem>>, vector<2x32xf32>
      tpu.vector_store %arg8[%c0_10, %c0_11], %11 {strides = array<i32>} : memref<2x32xf32, #tpu.memory_space<vmem>>, vector<2x32xf32>,
    } else {
    }
    %c0 = arith.constant 0 : index
    %c0_1 = arith.constant 0 : index
    %c0_2 = arith.constant 0 : index
    %3 = vector.load %arg2[%c0, %c0_1, %c0_2] : memref<2x32x256xf32, #tpu.memory_space<vmem>>, vector<2x32x256xf32>
    %c0_3 = arith.constant 0 : index
    %c0_4 = arith.constant 0 : index
    %4 = vector.load %arg8[%c0_3, %c0_4] : memref<2x32xf32, #tpu.memory_space<vmem>>, vector<2x32xf32>
    %cst = arith.constant dense<0.000000e+00> : vector<2x32xf32>
    %5 = vector.multi_reduction <add>, %3, %cst [2] : vector<2x32x256xf32> to vector<2x32xf32>
    %6 = arith.addf %4, %5 : vector<2x32xf32>
    %c0_5 = arith.constant 0 : index
    %c0_6 = arith.constant 0 : index
    %7 = vector.load %arg8[%c0_5, %c0_6] : memref<2x32xf32, #tpu.memory_space<vmem>>, vector<2x32xf32>
    tpu.vector_store %arg8[%c0_5, %c0_6], %6 {strides = array<i32>} : memref<2x32xf32, #tpu.memory_space<vmem>>, vector<2x32xf32>,
    %c0_i32_7 = arith.constant 0 : i32
    %8 = arith.cmpi eq, %arg1, %c0_i32_7 : i32
    %9 = arith.extui %8 : i1 to i32
    %c0_i32_8 = arith.constant 0 : i32
    %10 = arith.cmpi ne, %9, %c0_i32_8 : i32
    scf.if %10 {
      %c0_9 = arith.constant 0 : index
      %c0_10 = arith.constant 0 : index
      %11 = vector.load %arg8[%c0_9, %c0_10] : memref<2x32xf32, #tpu.memory_space<vmem>>, vector<2x32xf32>
      %cst_11 = arith.constant 3.906250e-03 : f32
      %12 = vector.broadcast %cst_11 : f32 to vector<2x32xf32>
      %13 = arith.mulf %11, %12 : vector<2x32xf32>
      %c0_12 = arith.constant 0 : index
      %c0_13 = arith.constant 0 : index
      %14 = vector.load %arg3[%c0_12, %c0_13] : memref<32x2xf32, #tpu.memory_space<vmem>>, vector<32x2xf32>
      %cst_14 = arith.constant dense<0.000000e+00> : vector<2x2xf32>
      %15 = tpu.matmul %13, %14, %cst_14 {dimension_numbers = #tpu.dot_dimension_numbers<[1], [0], [0], [1], [0, 0, 1, 1], [], []>} : vector<2x32xf32>, vector<32x2xf32>, vector<2x2xf32> -> vector<2x2xf32>
      %c0_15 = arith.constant 0 : index
      %c0_16 = arith.constant 0 : index
      %16 = vector.load %arg4[%c0_15, %c0_16] : memref<1x2xf32, #tpu.memory_space<vmem>>, vector<1x2xf32>
      %17 = vector.broadcast %16 : vector<1x2xf32> to vector<2x2xf32>
      %18 = arith.addf %15, %17 : vector<2x2xf32>
      %cst_17 = arith.constant 0.000000e+00 : f32
      %19 = vector.broadcast %cst_17 : f32 to vector<2x2xf32>
      %20 = arith.maximumf %18, %19 : vector<2x2xf32>
      %c0_18 = arith.constant 0 : index
      %c0_19 = arith.constant 0 : index
      %21 = vector.load %arg5[%c0_18, %c0_19] : memref<2x32xf32, #tpu.memory_space<vmem>>, vector<2x32xf32>
      %cst_20 = arith.constant dense<0.000000e+00> : vector<2x32xf32>
      %22 = tpu.matmul %20, %21, %cst_20 {dimension_numbers = #tpu.dot_dimension_numbers<[1], [0], [0], [1], [0, 0, 1, 1], [], []>} : vector<2x2xf32>, vector<2x32xf32>, vector<2x32xf32> -> vector<2x32xf32>
      %c0_21 = arith.constant 0 : index
      %c0_22 = arith.constant 0 : index
      %23 = vector.load %arg6[%c0_21, %c0_22] : memref<1x32xf32, #tpu.memory_space<vmem>>, vector<1x32xf32>
      %24 = vector.broadcast %23 : vector<1x32xf32> to vector<2x32xf32>
      %25 = arith.addf %22, %24 : vector<2x32xf32>
      %c0_23 = arith.constant 0 : index
      %c0_24 = arith.constant 0 : index
      %26 = vector.load %arg7[%c0_23, %c0_24] : memref<2x32xf32, #tpu.memory_space<vmem>>, vector<2x32xf32>
      tpu.vector_store %arg7[%c0_23, %c0_24], %25 {strides = array<i32>} : memref<2x32xf32, #tpu.memory_space<vmem>>, vector<2x32xf32>,
    } else {
    }
    return
  }
  func.func @transform_0(%arg0: i32, %arg1: i32) -> (i32, i32, i32) {
    %c0_i32 = arith.constant 0 : i32
    %c0_i32_0 = arith.constant 0 : i32
    return %arg0, %c0_i32, %arg1 : i32, i32, i32
  }
  func.func @transform_1(%arg0: i32, %arg1: i32) -> (i32, i32) {
    %c0_i32 = arith.constant 0 : i32
    %c0_i32_0 = arith.constant 0 : i32
    %c0_i32_1 = arith.constant 0 : i32
    return %c0_i32, %c0_i32_0 : i32, i32
  }
  func.func @transform_2(%arg0: i32, %arg1: i32) -> (i32, i32) {
    %c0_i32 = arith.constant 0 : i32
    %c0_i32_0 = arith.constant 0 : i32
    %c0_i32_1 = arith.constant 0 : i32
    return %c0_i32, %c0_i32_0 : i32, i32
  }
  func.func @transform_3(%arg0: i32, %arg1: i32) -> (i32, i32) {
    %c0_i32 = arith.constant 0 : i32
    %c0_i32_0 = arith.constant 0 : i32
    %c0_i32_1 = arith.constant 0 : i32
    return %c0_i32, %c0_i32_0 : i32, i32
  }
  func.func @transform_4(%arg0: i32, %arg1: i32) -> (i32, i32) {
    %c0_i32 = arith.constant 0 : i32
    %c0_i32_0 = arith.constant 0 : i32
    %c0_i32_1 = arith.constant 0 : i32
    return %c0_i32, %c0_i32_0 : i32, i32
  }
  func.func @transform_5(%arg0: i32, %arg1: i32) -> (i32, i32) {
    %c0_i32 = arith.constant 0 : i32
    %c0_i32_0 = arith.constant 0 : i32
    return %arg0, %c0_i32 : i32, i32
  }
}

module attributes {stable_mosaic.version = 11 : i64} {
  func.func @se_kernel(%arg0: i32, %arg1: i32, %arg2: memref<2x32x256xf32, #tpu.memory_space<vmem>>, %arg3: memref<32x2xf32, #tpu.memory_space<vmem>>, %arg4: memref<1x2xf32, #tpu.memory_space<vmem>>, %arg5: memref<2x32xf32, #tpu.memory_space<vmem>>, %arg6: memref<1x32xf32, #tpu.memory_space<vmem>>, %arg7: memref<2x32xf32, #tpu.memory_space<vmem>>, %arg8: memref<2x32xf32, #tpu.memory_space<vmem>>) attributes {dimension_semantics = [#tpu.dimension_semantics<parallel>, #tpu.dimension_semantics<arbitrary>], iteration_bounds = array<i64: 1, 1>, scalar_prefetch = 0 : i64, scratch_operands = 1 : i64, tpu.core_type = #tpu.core_type<tc>, window_params = [{transform_indices = @transform_0, window_bounds = array<i64: 2, 32, 256>}, {pipeline_mode = #tpu.pipeline_mode<synchronous>, transform_indices = @transform_1, window_bounds = array<i64: 32, 2>}, {pipeline_mode = #tpu.pipeline_mode<synchronous>, transform_indices = @transform_2, window_bounds = array<i64: 1, 2>}, {pipeline_mode = #tpu.pipeline_mode<synchronous>, transform_indices = @transform_3, window_bounds = array<i64: 2, 32>}, {pipeline_mode = #tpu.pipeline_mode<synchronous>, transform_indices = @transform_4, window_bounds = array<i64: 1, 32>}, {transform_indices = @transform_5, window_bounds = array<i64: 2, 32>}]} {
    %c0_i32 = arith.constant 0 : i32
    %0 = arith.cmpi eq, %arg1, %c0_i32 : i32
    %1 = arith.extui %0 : i1 to i32
    %c0_i32_0 = arith.constant 0 : i32
    %2 = arith.cmpi ne, %1, %c0_i32_0 : i32
    scf.if %2 {
      %cst_9 = arith.constant 0.000000e+00 : f32
      %11 = vector.broadcast %cst_9 : f32 to vector<2x32xf32>
      %c0_10 = arith.constant 0 : index
      %c0_11 = arith.constant 0 : index
      %12 = vector.load %arg8[%c0_10, %c0_11] : memref<2x32xf32, #tpu.memory_space<vmem>>, vector<2x32xf32>
      tpu.vector_store %arg8[%c0_10, %c0_11], %11 {strides = array<i32>} : memref<2x32xf32, #tpu.memory_space<vmem>>, vector<2x32xf32>,
    } else {
    }
    %c0 = arith.constant 0 : index
    %c0_1 = arith.constant 0 : index
    %c0_2 = arith.constant 0 : index
    %3 = vector.load %arg2[%c0, %c0_1, %c0_2] : memref<2x32x256xf32, #tpu.memory_space<vmem>>, vector<2x32x256xf32>
    %c0_3 = arith.constant 0 : index
    %c0_4 = arith.constant 0 : index
    %4 = vector.load %arg8[%c0_3, %c0_4] : memref<2x32xf32, #tpu.memory_space<vmem>>, vector<2x32xf32>
    %cst = arith.constant dense<0.000000e+00> : vector<2x32xf32>
    %5 = vector.multi_reduction <add>, %3, %cst [2] : vector<2x32x256xf32> to vector<2x32xf32>
    %6 = arith.addf %4, %5 : vector<2x32xf32>
    %c0_5 = arith.constant 0 : index
    %c0_6 = arith.constant 0 : index
    %7 = vector.load %arg8[%c0_5, %c0_6] : memref<2x32xf32, #tpu.memory_space<vmem>>, vector<2x32xf32>
    tpu.vector_store %arg8[%c0_5, %c0_6], %6 {strides = array<i32>} : memref<2x32xf32, #tpu.memory_space<vmem>>, vector<2x32xf32>,
    %c0_i32_7 = arith.constant 0 : i32
    %8 = arith.cmpi eq, %arg1, %c0_i32_7 : i32
    %9 = arith.extui %8 : i1 to i32
    %c0_i32_8 = arith.constant 0 : i32
    %10 = arith.cmpi ne, %9, %c0_i32_8 : i32
    scf.if %10 {
      %c0_9 = arith.constant 0 : index
      %c0_10 = arith.constant 0 : index
      %11 = vector.load %arg8[%c0_9, %c0_10] : memref<2x32xf32, #tpu.memory_space<vmem>>, vector<2x32xf32>
      %cst_11 = arith.constant 3.906250e-03 : f32
      %12 = vector.broadcast %cst_11 : f32 to vector<2x32xf32>
      %13 = arith.mulf %11, %12 : vector<2x32xf32>
      %c0_12 = arith.constant 0 : index
      %c0_13 = arith.constant 0 : index
      %14 = vector.load %arg3[%c0_12, %c0_13] : memref<32x2xf32, #tpu.memory_space<vmem>>, vector<32x2xf32>
      %cst_14 = arith.constant dense<0.000000e+00> : vector<2x2xf32>
      %15 = tpu.matmul %13, %14, %cst_14 {dimension_numbers = #tpu.dot_dimension_numbers<[1], [0], [0], [1], [0, 0, 1, 1], [], []>} : vector<2x32xf32>, vector<32x2xf32>, vector<2x2xf32> -> vector<2x2xf32>
      %c0_15 = arith.constant 0 : index
      %c0_16 = arith.constant 0 : index
      %16 = vector.load %arg4[%c0_15, %c0_16] : memref<1x2xf32, #tpu.memory_space<vmem>>, vector<1x2xf32>
      %17 = vector.broadcast %16 : vector<1x2xf32> to vector<2x2xf32>
      %18 = arith.addf %15, %17 : vector<2x2xf32>
      %cst_17 = arith.constant 0.000000e+00 : f32
      %19 = vector.broadcast %cst_17 : f32 to vector<2x2xf32>
      %20 = arith.maximumf %18, %19 : vector<2x2xf32>
      %c0_18 = arith.constant 0 : index
      %c0_19 = arith.constant 0 : index
      %21 = vector.load %arg5[%c0_18, %c0_19] : memref<2x32xf32, #tpu.memory_space<vmem>>, vector<2x32xf32>
      %cst_20 = arith.constant dense<0.000000e+00> : vector<2x32xf32>
      %22 = tpu.matmul %20, %21, %cst_20 {dimension_numbers = #tpu.dot_dimension_numbers<[1], [0], [0], [1], [0, 0, 1, 1], [], []>} : vector<2x2xf32>, vector<2x32xf32>, vector<2x32xf32> -> vector<2x32xf32>
      %c0_21 = arith.constant 0 : index
      %c0_22 = arith.constant 0 : index
      %23 = vector.load %arg6[%c0_21, %c0_22] : memref<1x32xf32, #tpu.memory_space<vmem>>, vector<1x32xf32>
      %24 = vector.broadcast %23 : vector<1x32xf32> to vector<2x32xf32>
      %25 = arith.addf %22, %24 : vector<2x32xf32>
      %c0_23 = arith.constant 0 : index
      %c0_24 = arith.constant 0 : index
      %26 = vector.load %arg7[%c0_23, %c0_24] : memref<2x32xf32, #tpu.memory_space<vmem>>, vector<2x32xf32>
      tpu.vector_store %arg7[%c0_23, %c0_24], %25 {strides = array<i32>} : memref<2x32xf32, #tpu.memory_space<vmem>>, vector<2x32xf32>,
    } else {
    }
    return
  }
  func.func @transform_0(%arg0: i32, %arg1: i32) -> (i32, i32, i32) {
    %c0_i32 = arith.constant 0 : i32
    %c0_i32_0 = arith.constant 0 : i32
    return %arg0, %c0_i32, %arg1 : i32, i32, i32
  }
  func.func @transform_1(%arg0: i32, %arg1: i32) -> (i32, i32) {
    %c0_i32 = arith.constant 0 : i32
    %c0_i32_0 = arith.constant 0 : i32
    %c0_i32_1 = arith.constant 0 : i32
    return %c0_i32, %c0_i32_0 : i32, i32
  }
  func.func @transform_2(%arg0: i32, %arg1: i32) -> (i32, i32) {
    %c0_i32 = arith.constant 0 : i32
    %c0_i32_0 = arith.constant 0 : i32
    %c0_i32_1 = arith.constant 0 : i32
    return %c0_i32, %c0_i32_0 : i32, i32
  }
  func.func @transform_3(%arg0: i32, %arg1: i32) -> (i32, i32) {
    %c0_i32 = arith.constant 0 : i32
    %c0_i32_0 = arith.constant 0 : i32
    %c0_i32_1 = arith.constant 0 : i32
    return %c0_i32, %c0_i32_0 : i32, i32
  }
  func.func @transform_4(%arg0: i32, %arg1: i32) -> (i32, i32) {
    %c0_i32 = arith.constant 0 : i32
    %c0_i32_0 = arith.constant 0 : i32
    %c0_i32_1 = arith.constant 0 : i32
    return %c0_i32, %c0_i32_0 : i32, i32
  }
  func.func @transform_5(%arg0: i32, %arg1: i32) -> (i32, i32) {
    %c0_i32 = arith.constant 0 : i32
    %c0_i32_0 = arith.constant 0 : i32
    return %arg0, %c0_i32 : i32, i32
  }
}

</mosaic_0001>

<bundles_post_ra>
// kernel: tpu_custom_call.1
= control target key start
LH: loop header
LB: loop body
LE: loop exit
PB: predicated region body
PF: predicated region fallthrough
CT: control target
= control target key end

     0   :  { %10 = vsyncpa [#allocation4], 0  ;;  %s509_s0 = inlined_call_operand.hbm [shape: f32[2,32,256], index: 0, kind: input, shape index: {}]   ;;  %s510_s1 = inlined_call_operand.vmem [shape: f32[32,2], index: 1, kind: input, shape index: {}]   ;;  %s511_s2 = inlined_call_operand.vmem [shape: f32[1,2], index: 2, kind: input, shape index: {}]   ;;  %s512_s3 = inlined_call_operand.vmem [shape: f32[2,32], index: 3, kind: input, shape index: {}]   ;;  %s513_s4 = inlined_call_operand.vmem [shape: f32[1,32], index: 4, kind: input, shape index: {}]   ;;  %s514_s5 = inlined_call_operand.hbm [shape: f32[2,32], index: 5, kind: output, shape index: {}]  }
   0x1   :  { %11 = vsyncpa [#allocation5], 0  ;;  %s424_s18 = smov [#allocation3]   ;;  %s376_s22 = scalar_lea.hbm %s509_s0, 2048 }
   0x2   :  { %s17_s19 = sshll.u32 %s424_s18, 4  ;;  %p377_p0 = scmp.ne.s32.totalorder %s509_s0, %s376_s22  ;;  %s18_s19 = int_to_ptr.vmem [resolvable:$true] %s17_s19 }
   0x3   :  { %p380_p1 = scmp.lt.u32.totalorder %s376_s22, %s509_s0 }
   0x5   :  { %p382_p2 = pnand %p380_p1, %p377_p0 }
   0x7   :  { %385 = shalt.err (!%p382_p2)
}
   0x8   :  { %s386_s27 = scalar_lea.vmem %s18_s19, 2048  ;;  %p391_p4 = scmp.lt.s32.totalorder %s18_s19, %s18_s19 }
   0x9   :  { %p387_p3 = scmp.ne.s32.totalorder %s18_s19, %s386_s27  ;;  %p392_p5 = scmp.lt.s32.totalorder %s386_s27, %s386_s27 }
   0xb   :  { %p393_p6 = por %p392_p5, %p391_p4 }
   0xd   :  { %p394_p7 = pnand %p393_p6, %p387_p3 }
   0xf   :  { %397 = shalt.err (!%p394_p7)
}
  0x10   :  { %s425_s28 = smov 256   ;;  %s426_s29 = smov 16  }
  0x11   :  { %23 = dma.hbm_to_vmem [thread:$0]  %s509_s0, 2048, %s18_s19, [#allocation4], %s425_s28, %s425_s28, %s426_s29  }
  0x12   :  { %420 = dma.done.wait [#allocation4], 2048  }
  0x13   :  { %421 = vsyncadd [#allocation4], 4294965248  ;;  %v49_v0 = vld [vmem:[#allocation3 + $0x40] sm:$0xff]  ;;  %v50_v1 = vld [vmem:[#allocation3 + $0x48] sm:$0xff]  ;;  %vm39_vm0 = vcmask 254976   ;;  %v427_v24 = vmov 0.0   ;;  %v90_v32 = vlaneseq }
  0x14   :  { %v41_v2 = vld [vmem:[#allocation3] sm:$0xff]  ;;  %v70_v3 = vadd.f32 %v50_v1, %v49_v0  ;;  %v42_v4 = vld [vmem:[#allocation3 + $0x8] sm:$0xff]  ;;  %v51_v5 = vld [vmem:[#allocation3 + $0x50] sm:$0xff]  ;;  %40 = vst.msk [vmem:[#allocation2] sm:$0x3] %vm39_vm0, %v427_v24  ;;  %358 = vmatprep.subr.mxu1 %v427_v24  ;;  %v428_v28 = vmov 0.0|0.0  }
  0x15   :  { %v52_v6 = vld [vmem:[#allocation3 + $0x58] sm:$0xff]  ;;  %v58_v7 = vadd.f32 %v42_v4, %v41_v2  ;;  %v43_v8 = vld [vmem:[#allocation3 + $0x10] sm:$0xff]  ;;  %v53_v12 = vld [vmem:[#allocation3 + $0x60] sm:$0xff]  ;;  %363 = vmatprep.subr.bf16.mxu0 %v428_v28  ;;  %vm429_vm1 = vmmov 0   ;;  %v91_v33 = vand.u32 127, %v90_v32  ;;  %v93_v38 = vshrl.u32 %v90_v32, 7 }
  0x16   :  { %v44_v9 = vld [vmem:[#allocation3 + $0x18] sm:$0xff]  ;;  %71 = vadd.xlane.f32.xlu1 %v70_v3  ;;  %v73_v10 = vadd.f32 %v52_v6, %v51_v5  ;;  %v54_v13 = vld [vmem:[#allocation3 + $0x68] sm:$0xff]  ;;  %v45_v14 = vld [vmem:[#allocation3 + $0x20] sm:$0xff]  ;;  %355 = vmatprep.mubr.msk.f32.mxu0 %vm429_vm1, %v427_v24  ;;  %vm101_vm2 = vcmask 130112   ;;  %vm108_vm3 = vcmask 195712   ;;  %vm115_vm4 = vcmask 261312  }
  0x17   :  { %59 = vadd.xlane.f32.xlu0 %v58_v7  ;;  %v61_v11 = vadd.f32 %v44_v9, %v43_v8  ;;  %v46_v15 = vld [vmem:[#allocation3 + $0x28] sm:$0xff]  ;;  %v76_v16 = vadd.f32 %v54_v13, %v53_v12  ;;  %v55_v18 = vld [vmem:[#allocation3 + $0x70] sm:$0xff]  ;;  %v56_v19 = vld [vmem:[#allocation3 + $0x78] sm:$0xff]  ;;  %360 = vmatprep.mubr.msk.f32.mxu1 %vm429_vm1, %v427_v24  ;;  %v96_v36 = vadd.s32 4294967288, %v91_v33  ;;  %v103_v37 = vadd.s32 4294967280, %v91_v33  ;;  %s430_s19 = smov [#allocation6]  }
  0x18   :  { %v64_v17 = vadd.f32 %v46_v15, %v45_v14  ;;  %v47_v20 = vld [vmem:[#allocation3 + $0x30] sm:$0xff]  ;;  %v48_v21 = vld [vmem:[#allocation3 + $0x38] sm:$0xff]  ;;  %v79_v22 = vadd.f32 %v56_v19, %v55_v18  ;;  %v148_v26 = vld [vmem:[%s510_s1 + $0x8] sm:$0xff]  ;;  %v110_v42 = vadd.s32 4294967272, %v91_v33  ;;  %v94_v44 = vsub.s32 %v91_v33, %v93_v38  ;;  %s326_s20 = sshll.u32 %s430_s19, 4  ;;  %s327_s20 = int_to_ptr.vmem [resolvable:$true] %s326_s20 }
  0x19   :  { %v67_v23 = vadd.f32 %v48_v21, %v47_v20  ;;  %v147_v25 = vld [vmem:[%s510_s1] sm:$0xff]  ;;  %v149_v27 = vld [vmem:[%s510_s1 + $0x10] sm:$0xff]  ;;  %v150_v30 = vld [vmem:[%s510_s1 + $0x18] sm:$0xff]  ;;  %v99_v40 = vsub.s32 %v96_v36, %v93_v38  ;;  %v106_v43 = vsub.s32 %v103_v37, %v93_v38  ;;  %vm136_vm5 = vcmask 1041409   ;;  %p403_p9 = scmp.lt.s32.totalorder %s327_s20, %s327_s20 }
  0x1a   :  { %74 = vadd.xlane.f32.xlu1 %v73_v10  ;;  %v364_v29 = vpack.c.bf16 %v148_v26, %v147_v25  ;;  %v367_v31 = vpack.c.bf16 %v150_v30, %v149_v27  ;;  %v113_v48 = vsub.s32 %v110_v42, %v93_v38  ;;  %vm158_vm6 = vcmask 261120   ;;  %v233_v5 = vld [vmem:[%s512_s3] sm:$0x3]  ;;  %s398_s3 = scalar_lea.vmem %s327_s20, 32 }
  0x1b   :  { %62 = vadd.xlane.f32.xlu0 %v61_v11  ;;  %v57_v63 = vld [vmem:[#allocation2] sm:$0x3]  ;;  %vm245_vm7 = vcmask 1041408   ;;  %vm241_vm8 = vcmask 15360   ;;  %p399_p8 = scmp.ne.s32.totalorder %s327_s20, %s398_s3  ;;  %p404_p10 = scmp.lt.s32.totalorder %s398_s3, %s398_s3 }
  0x1c   :  { %365 = vmatpush3.bf16.msra.mxu0 %v364_v29  ;;  %359 = vmatpush3.msk.msra.mxu1 %vm245_vm7, %v233_v5  ;;  %v335_v6 = vld [vmem:[%s511_s2] ss:$0 sm:$0xff] }
  0x1d   :  { %366 = vmatprep.subr.bf16.mxu0 %v428_v28  ;;  %v337_v11 = vld [vmem:[%s513_s4] ss:$0 sm:$0xff]  ;;  %p405_p11 = por %p404_p10, %p403_p9 }
  0x1e   :  { %77 = vadd.xlane.f32.xlu1 %v76_v16 }
  0x1f   :  { %65 = vadd.xlane.f32.xlu0 %v64_v17  ;;  %p406_p12 = pnand %p405_p11, %p399_p8 }
  0x20   :  { %368 = vmatpush3.bf16.msra.mxu0 %v367_v31 }
  0x22   :  { %80 = vadd.xlane.f32.xlu1 %v79_v22 }
  0x23   :  { %68 = vadd.xlane.f32.xlu0 %v67_v23 }
  0xa3   :  { %v72_v34 = vpop.xlane.xlu1 %71 }
  0xa4   :  { %v60_v35 = vpop.xlane.xlu0 %59  ;;  %v120_v51 = vrot.slane %v72_v34, %v94_v44 }
  0xa5   :  { %v95_v53 = vrot.slane %v60_v35, %v94_v44 }
  0xa7   :  { %v75_v39 = vpop.xlane.xlu1 %74 }
  0xa8   :  { %v63_v41 = vpop.xlane.xlu0 %62  ;;  %v124_v46 = vrot.slane %v75_v39, %v99_v40 }
  0xa9   :  { %v100_v49 = vrot.slane %v63_v41, %v99_v40 }
  0xaa   :  { %v125_v55 = vsel %vm101_vm2, %v124_v46, %v120_v51 }
  0xab   :  { %v78_v45 = vpop.xlane.xlu1 %77  ;;  %v102_v58 = vsel %vm101_vm2, %v100_v49, %v95_v53 }
  0xac   :  { %v66_v47 = vpop.xlane.xlu0 %65  ;;  %v129_v50 = vrot.slane %v78_v45, %v106_v43 }
  0xad   :  { %v107_v52 = vrot.slane %v66_v47, %v106_v43 }
  0xae   :  { %v130_v59 = vsel %vm108_vm3, %v129_v50, %v125_v55 }
  0xaf   :  { %v81_v54 = vpop.xlane.xlu1 %80  ;;  %v109_v61 = vsel %vm108_vm3, %v107_v52, %v102_v58 }
  0xb0   :  { %v134_v56 = vrot.slane %v81_v54, %v113_v48  ;;  %v69_v57 = vpop.xlane.xlu0 %68 }
  0xb1   :  { %v114_v60 = vrot.slane %v69_v57, %v113_v48 }
  0xb2   :  { %v135_v62 = vsel %vm115_vm4, %v134_v56, %v130_v59 }
  0xb3   :  { %v116_v0 = vsel %vm115_vm4, %v114_v60, %v109_v61 }
  0xb4   :  { %v137_v1 = vsel %vm136_vm5, %v135_v62, %v116_v0 }
  0xb5   :  { %v139_v2 = vadd.f32 %v137_v1, %v57_v63 }
  0xb7   :  { %141 = vst.msk [vmem:[#allocation2] sm:$0x3] %vm39_vm0, %v139_v2 }
  0xbe   :  { %v145_v3 = vld [vmem:[#allocation2] sm:$0x3] }
  0xbf   :  { %v146_v4 = vmul.f32 0.00390625, %v145_v3 }
  0xc1   :  { %356 = vmatmul.mubr.msk.f32.vlgmr.msra.gmra.mrb[0].mxu0 %vm158_vm6, %v146_v4 }
 0x194   :  { %v228_v7 = vpop.f32.mrb[0].mxu0 }
 0x195   :  { %v229_v8 = vadd.f32 %v335_v6, %v228_v7  ;;  %v357_v9 = vpop.f32.mrb[1].mxu0 }
 0x197   :  { %v232_v10 = vmax.f32 %v229_v8, 0.0 }
 0x199   :  { %361 = vmatmul.mubr.msk.f32.vlgmr.msra.gmra.mrb[0].mxu1 %vm241_vm8, %v232_v10 }
 0x26c   :  { %v315_v12 = vpop.f32.mrb[0].mxu1 }
 0x26d   :  { %v316_v13 = vadd.f32 %v337_v11, %v315_v12  ;;  %v362_v14 = vpop.f32.mrb[1].mxu1 }
 0x26f   :  { %319 = vst.msk [vmem:[#allocation6] sm:$0x3] %vm39_vm0, %v316_v13 }
 0x270   :  { %409 = shalt.err (!%p406_p12)
}
 0x271   :  { %s410_s22 = scalar_lea.hbm %s514_s5, 32 }
 0x272   :  { %p411_p13 = scmp.ne.s32.totalorder %s514_s5, %s410_s22  ;;  %p414_p0 = scmp.lt.u32.totalorder %s410_s22, %s514_s5 }
 0x274   :  { %p416_p1 = pnand %p414_p0, %p411_p13 }
 0x276   :  { %419 = shalt.err (!%p416_p1)
}
 0x277   :  { %329 = dma.vmem_to_hbm [thread:$0]  %s327_s20, 32, %s514_s5, [#allocation5]  }
 0x278   :  { %422 = dma.done.wait [#allocation5], 32  }
 0x279   :  { %423 = vsyncadd [#allocation5], 4294967264 }
 0x27a   :  { %333 = vsyncpa [#allocation4], 1 }
 0x27b   :  { %334 = vsyncpa [#allocation5], 1 }

// kernel: tpu_custom_call.1
= control target key start
LH: loop header
LB: loop body
LE: loop exit
PB: predicated region body
PF: predicated region fallthrough
CT: control target
= control target key end

     0   :  { %10 = vsyncpa [#allocation4], 0  ;;  %s509_s0 = inlined_call_operand.hbm [shape: f32[2,32,256], index: 0, kind: input, shape index: {}]   ;;  %s510_s1 = inlined_call_operand.vmem [shape: f32[32,2], index: 1, kind: input, shape index: {}]   ;;  %s511_s2 = inlined_call_operand.vmem [shape: f32[1,2], index: 2, kind: input, shape index: {}]   ;;  %s512_s3 = inlined_call_operand.vmem [shape: f32[2,32], index: 3, kind: input, shape index: {}]   ;;  %s513_s4 = inlined_call_operand.vmem [shape: f32[1,32], index: 4, kind: input, shape index: {}]   ;;  %s514_s5 = inlined_call_operand.hbm [shape: f32[2,32], index: 5, kind: output, shape index: {}]  }
   0x1   :  { %11 = vsyncpa [#allocation5], 0  ;;  %s424_s18 = smov [#allocation3]   ;;  %s376_s22 = scalar_lea.hbm %s509_s0, 2048 }
   0x2   :  { %s17_s19 = sshll.u32 %s424_s18, 4  ;;  %p377_p0 = scmp.ne.s32.totalorder %s509_s0, %s376_s22  ;;  %s18_s19 = int_to_ptr.vmem [resolvable:$true] %s17_s19 }
   0x3   :  { %p380_p1 = scmp.lt.u32.totalorder %s376_s22, %s509_s0 }
   0x5   :  { %p382_p2 = pnand %p380_p1, %p377_p0 }
   0x7   :  { %385 = shalt.err (!%p382_p2)
}
   0x8   :  { %s386_s27 = scalar_lea.vmem %s18_s19, 2048  ;;  %p391_p4 = scmp.lt.s32.totalorder %s18_s19, %s18_s19 }
   0x9   :  { %p387_p3 = scmp.ne.s32.totalorder %s18_s19, %s386_s27  ;;  %p392_p5 = scmp.lt.s32.totalorder %s386_s27, %s386_s27 }
   0xb   :  { %p393_p6 = por %p392_p5, %p391_p4 }
   0xd   :  { %p394_p7 = pnand %p393_p6, %p387_p3 }
   0xf   :  { %397 = shalt.err (!%p394_p7)
}
  0x10   :  { %s425_s28 = smov 256   ;;  %s426_s29 = smov 16  }
  0x11   :  { %23 = dma.hbm_to_vmem [thread:$0]  %s509_s0, 2048, %s18_s19, [#allocation4], %s425_s28, %s425_s28, %s426_s29  }
  0x12   :  { %420 = dma.done.wait [#allocation4], 2048  }
  0x13   :  { %421 = vsyncadd [#allocation4], 4294965248  ;;  %v49_v0 = vld [vmem:[#allocation3 + $0x40] sm:$0xff]  ;;  %v50_v1 = vld [vmem:[#allocation3 + $0x48] sm:$0xff]  ;;  %vm39_vm0 = vcmask 254976   ;;  %v427_v24 = vmov 0.0   ;;  %v90_v32 = vlaneseq }
  0x14   :  { %v41_v2 = vld [vmem:[#allocation3] sm:$0xff]  ;;  %v70_v3 = vadd.f32 %v50_v1, %v49_v0  ;;  %v42_v4 = vld [vmem:[#allocation3 + $0x8] sm:$0xff]  ;;  %v51_v5 = vld [vmem:[#allocation3 + $0x50] sm:$0xff]  ;;  %40 = vst.msk [vmem:[#allocation2] sm:$0x3] %vm39_vm0, %v427_v24  ;;  %358 = vmatprep.subr.mxu1 %v427_v24  ;;  %v428_v28 = vmov 0.0|0.0  }
  0x15   :  { %v52_v6 = vld [vmem:[#allocation3 + $0x58] sm:$0xff]  ;;  %v58_v7 = vadd.f32 %v42_v4, %v41_v2  ;;  %v43_v8 = vld [vmem:[#allocation3 + $0x10] sm:$0xff]  ;;  %v53_v12 = vld [vmem:[#allocation3 + $0x60] sm:$0xff]  ;;  %363 = vmatprep.subr.bf16.mxu0 %v428_v28  ;;  %vm429_vm1 = vmmov 0   ;;  %v91_v33 = vand.u32 127, %v90_v32  ;;  %v93_v38 = vshrl.u32 %v90_v32, 7 }
  0x16   :  { %v44_v9 = vld [vmem:[#allocation3 + $0x18] sm:$0xff]  ;;  %71 = vadd.xlane.f32.xlu1 %v70_v3  ;;  %v73_v10 = vadd.f32 %v52_v6, %v51_v5  ;;  %v54_v13 = vld [vmem:[#allocation3 + $0x68] sm:$0xff]  ;;  %v45_v14 = vld [vmem:[#allocation3 + $0x20] sm:$0xff]  ;;  %355 = vmatprep.mubr.msk.f32.mxu0 %vm429_vm1, %v427_v24  ;;  %vm101_vm2 = vcmask 130112   ;;  %vm108_vm3 = vcmask 195712   ;;  %vm115_vm4 = vcmask 261312  }
  0x17   :  { %59 = vadd.xlane.f32.xlu0 %v58_v7  ;;  %v61_v11 = vadd.f32 %v44_v9, %v43_v8  ;;  %v46_v15 = vld [vmem:[#allocation3 + $0x28] sm:$0xff]  ;;  %v76_v16 = vadd.f32 %v54_v13, %v53_v12  ;;  %v55_v18 = vld [vmem:[#allocation3 + $0x70] sm:$0xff]  ;;  %v56_v19 = vld [vmem:[#allocation3 + $0x78] sm:$0xff]  ;;  %360 = vmatprep.mubr.msk.f32.mxu1 %vm429_vm1, %v427_v24  ;;  %v96_v36 = vadd.s32 4294967288, %v91_v33  ;;  %v103_v37 = vadd.s32 4294967280, %v91_v33  ;;  %s430_s19 = smov [#allocation6]  }
  0x18   :  { %v64_v17 = vadd.f32 %v46_v15, %v45_v14  ;;  %v47_v20 = vld [vmem:[#allocation3 + $0x30] sm:$0xff]  ;;  %v48_v21 = vld [vmem:[#allocation3 + $0x38] sm:$0xff]  ;;  %v79_v22 = vadd.f32 %v56_v19, %v55_v18  ;;  %v148_v26 = vld [vmem:[%s510_s1 + $0x8] sm:$0xff]  ;;  %v110_v42 = vadd.s32 4294967272, %v91_v33  ;;  %v94_v44 = vsub.s32 %v91_v33, %v93_v38  ;;  %s326_s20 = sshll.u32 %s430_s19, 4  ;;  %s327_s20 = int_to_ptr.vmem [resolvable:$true] %s326_s20 }
  0x19   :  { %v67_v23 = vadd.f32 %v48_v21, %v47_v20  ;;  %v147_v25 = vld [vmem:[%s510_s1] sm:$0xff]  ;;  %v149_v27 = vld [vmem:[%s510_s1 + $0x10] sm:$0xff]  ;;  %v150_v30 = vld [vmem:[%s510_s1 + $0x18] sm:$0xff]  ;;  %v99_v40 = vsub.s32 %v96_v36, %v93_v38  ;;  %v106_v43 = vsub.s32 %v103_v37, %v93_v38  ;;  %vm136_vm5 = vcmask 1041409   ;;  %p403_p9 = scmp.lt.s32.totalorder %s327_s20, %s327_s20 }
  0x1a   :  { %74 = vadd.xlane.f32.xlu1 %v73_v10  ;;  %v364_v29 = vpack.c.bf16 %v148_v26, %v147_v25  ;;  %v367_v31 = vpack.c.bf16 %v150_v30, %v149_v27  ;;  %v113_v48 = vsub.s32 %v110_v42, %v93_v38  ;;  %vm158_vm6 = vcmask 261120   ;;  %v233_v5 = vld [vmem:[%s512_s3] sm:$0x3]  ;;  %s398_s3 = scalar_lea.vmem %s327_s20, 32 }
  0x1b   :  { %62 = vadd.xlane.f32.xlu0 %v61_v11  ;;  %v57_v63 = vld [vmem:[#allocation2] sm:$0x3]  ;;  %vm245_vm7 = vcmask 1041408   ;;  %vm241_vm8 = vcmask 15360   ;;  %p399_p8 = scmp.ne.s32.totalorder %s327_s20, %s398_s3  ;;  %p404_p10 = scmp.lt.s32.totalorder %s398_s3, %s398_s3 }
  0x1c   :  { %365 = vmatpush3.bf16.msra.mxu0 %v364_v29  ;;  %359 = vmatpush3.msk.msra.mxu1 %vm245_vm7, %v233_v5  ;;  %v335_v6 = vld [vmem:[%s511_s2] ss:$0 sm:$0xff] }
  0x1d   :  { %366 = vmatprep.subr.bf16.mxu0 %v428_v28  ;;  %v337_v11 = vld [vmem:[%s513_s4] ss:$0 sm:$0xff]  ;;  %p405_p11 = por %p404_p10, %p403_p9 }
  0x1e   :  { %77 = vadd.xlane.f32.xlu1 %v76_v16 }
  0x1f   :  { %65 = vadd.xlane.f32.xlu0 %v64_v17  ;;  %p406_p12 = pnand %p405_p11, %p399_p8 }
  0x20   :  { %368 = vmatpush3.bf16.msra.mxu0 %v367_v31 }
  0x22   :  { %80 = vadd.xlane.f32.xlu1 %v79_v22 }
  0x23   :  { %68 = vadd.xlane.f32.xlu0 %v67_v23 }
  0xa3   :  { %v72_v34 = vpop.xlane.xlu1 %71 }
  0xa4   :  { %v60_v35 = vpop.xlane.xlu0 %59  ;;  %v120_v51 = vrot.slane %v72_v34, %v94_v44 }
  0xa5   :  { %v95_v53 = vrot.slane %v60_v35, %v94_v44 }
  0xa7   :  { %v75_v39 = vpop.xlane.xlu1 %74 }
  0xa8   :  { %v63_v41 = vpop.xlane.xlu0 %62  ;;  %v124_v46 = vrot.slane %v75_v39, %v99_v40 }
  0xa9   :  { %v100_v49 = vrot.slane %v63_v41, %v99_v40 }
  0xaa   :  { %v125_v55 = vsel %vm101_vm2, %v124_v46, %v120_v51 }
  0xab   :  { %v78_v45 = vpop.xlane.xlu1 %77  ;;  %v102_v58 = vsel %vm101_vm2, %v100_v49, %v95_v53 }
  0xac   :  { %v66_v47 = vpop.xlane.xlu0 %65  ;;  %v129_v50 = vrot.slane %v78_v45, %v106_v43 }
  0xad   :  { %v107_v52 = vrot.slane %v66_v47, %v106_v43 }
  0xae   :  { %v130_v59 = vsel %vm108_vm3, %v129_v50, %v125_v55 }
  0xaf   :  { %v81_v54 = vpop.xlane.xlu1 %80  ;;  %v109_v61 = vsel %vm108_vm3, %v107_v52, %v102_v58 }
  0xb0   :  { %v134_v56 = vrot.slane %v81_v54, %v113_v48  ;;  %v69_v57 = vpop.xlane.xlu0 %68 }
  0xb1   :  { %v114_v60 = vrot.slane %v69_v57, %v113_v48 }
  0xb2   :  { %v135_v62 = vsel %vm115_vm4, %v134_v56, %v130_v59 }
  0xb3   :  { %v116_v0 = vsel %vm115_vm4, %v114_v60, %v109_v61 }
  0xb4   :  { %v137_v1 = vsel %vm136_vm5, %v135_v62, %v116_v0 }
  0xb5   :  { %v139_v2 = vadd.f32 %v137_v1, %v57_v63 }
  0xb7   :  { %141 = vst.msk [vmem:[#allocation2] sm:$0x3] %vm39_vm0, %v139_v2 }
  0xbe   :  { %v145_v3 = vld [vmem:[#allocation2] sm:$0x3] }
  0xbf   :  { %v146_v4 = vmul.f32 0.00390625, %v145_v3 }
  0xc1   :  { %356 = vmatmul.mubr.msk.f32.vlgmr.msra.gmra.mrb[0].mxu0 %vm158_vm6, %v146_v4 }
 0x194   :  { %v228_v7 = vpop.f32.mrb[0].mxu0 }
 0x195   :  { %v229_v8 = vadd.f32 %v335_v6, %v228_v7  ;;  %v357_v9 = vpop.f32.mrb[1].mxu0 }
 0x197   :  { %v232_v10 = vmax.f32 %v229_v8, 0.0 }
 0x199   :  { %361 = vmatmul.mubr.msk.f32.vlgmr.msra.gmra.mrb[0].mxu1 %vm241_vm8, %v232_v10 }
 0x26c   :  { %v315_v12 = vpop.f32.mrb[0].mxu1 }
 0x26d   :  { %v316_v13 = vadd.f32 %v337_v11, %v315_v12  ;;  %v362_v14 = vpop.f32.mrb[1].mxu1 }
 0x26f   :  { %319 = vst.msk [vmem:[#allocation6] sm:$0x3] %vm39_vm0, %v316_v13 }
 0x270   :  { %409 = shalt.err (!%p406_p12)
}
 0x271   :  { %s410_s22 = scalar_lea.hbm %s514_s5, 32 }
 0x272   :  { %p411_p13 = scmp.ne.s32.totalorder %s514_s5, %s410_s22  ;;  %p414_p0 = scmp.lt.u32.totalorder %s410_s22, %s514_s5 }
 0x274   :  { %p416_p1 = pnand %p414_p0, %p411_p13 }
 0x276   :  { %419 = shalt.err (!%p416_p1)
}
 0x277   :  { %329 = dma.vmem_to_hbm [thread:$0]  %s327_s20, 32, %s514_s5, [#allocation5]  }
 0x278   :  { %422 = dma.done.wait [#allocation5], 32  }
 0x279   :  { %423 = vsyncadd [#allocation5], 4294967264 }
 0x27a   :  { %333 = vsyncpa [#allocation4], 1 }
 0x27b   :  { %334 = vsyncpa [#allocation5], 1 }

</bundles_post_ra>
